<compile_context>
chip_gen: v5e
topology: v5e:2x2
jax: 0.10.0
libtpu: 0.0.40
codegen_flags: <defaults>
</compile_context>

<pallas_src>
import jax
import jax.numpy as jnp
import numpy as np
from jax.experimental import pallas as pl
from jax.experimental.pallas import tpu as pltpu  # noqa: F401  (TPU backend)

PAD_ID = 1
LANE = 128


def _round_up(n, m):
    return ((n + m - 1) // m) * m


def decoder_kernel(tok_ref, h_ref, c_ref, emb_ref, w_g_ref, b_g_ref,
                   w_fc_ref, b_fc_ref,
                   pred_ref, hc_ref):
    B = h_ref.shape[0]
    H = h_ref.shape[1]
    V = emb_ref.shape[0]

    # ---- embedding gather as one-hot matmul on the MXU -------------------
    tok = tok_ref[...]                                        # (B, 1) int32
    col = jax.lax.broadcasted_iota(jnp.int32, (B, V), 1)      # (B, V)
    onehot = (col == tok).astype(jnp.float32)                 # (B, V)
    x = jnp.dot(onehot, emb_ref[...],
                preferred_element_type=jnp.float32)           # (B, E)

    h = h_ref[...]                                            # (B, H)
    c = c_ref[...]                                            # (B, H)

    # ---- single fused, lane-dense gate matmul ------------------------------
    xh = jnp.concatenate([x, h], axis=-1)                     # (B, E+H)
    gates = (jnp.dot(xh, w_g_ref[...],
                     preferred_element_type=jnp.float32)
             + b_g_ref[...])                                  # (B, 4H)

    i_g = jax.nn.sigmoid(gates[:, 0 * H:1 * H])
    f_g = jax.nn.sigmoid(gates[:, 1 * H:2 * H])
    g_g = jnp.tanh(gates[:, 2 * H:3 * H])
    o_g = jax.nn.sigmoid(gates[:, 3 * H:4 * H])

    c_new = f_g * c + i_g * g_g
    h_new = o_g * jnp.tanh(c_new)

    # ---- lane-dense output projection (V padded to 128) ------------------
    pred_ref[...] = (jnp.dot(h_new, w_fc_ref[...],
                             preferred_element_type=jnp.float32)
                     + b_fc_ref[...])                         # (B, VP)

    # ---- pack h|c into one lane-dense (B, 128) slab -----------------------
    pad_w = hc_ref.shape[1] - 2 * H
    parts = [h_new, c_new]
    if pad_w > 0:
        parts.append(jnp.zeros((B, pad_w), jnp.float32))
    hc_ref[...] = jnp.concatenate(parts, axis=-1)


def pack_params(params):
    """Fuse per-gate weights into one (E+H, 4H) matrix and pad fc to 128 lanes."""
    E = params["w_ih"].shape[1]
    H = params["w_ih"].shape[2]
    V = params["w_fc"].shape[1]
    # (4, E, H) -> (E, 4H) with gate order i,f,g,o along column blocks.
    w_ih = jnp.transpose(params["w_ih"], (1, 0, 2)).reshape(E, 4 * H)
    w_hh = jnp.transpose(params["w_hh"], (1, 0, 2)).reshape(H, 4 * H)
    w_g = jnp.concatenate([w_ih, w_hh], axis=0)               # (E+H, 4H)
    b_g = jnp.transpose(params["b"], (1, 0, 2)).reshape(1, 4 * H)
    VP = _round_up(V, LANE)
    w_fc = jnp.pad(params["w_fc"], ((0, 0), (0, VP - V)))     # (H, VP)
    b_fc = jnp.pad(params["b_fc"], ((0, 0), (0, VP - V)))     # (1, VP)
    return w_g, b_g, w_fc, b_fc


def decoder_step(tokens, hidden, cell, params):
    """tokens: (B,) int32; hidden, cell: (n_layers=1, B, H).
    Returns (prediction (B, V), hidden (1, B, H), cell (1, B, H))."""
    emb = params["emb"]                      # (V, E), PAD_ID row is zero
    V, E = emb.shape
    h0, c0 = hidden[0], cell[0]
    B, H = h0.shape

    w_g, b_g, w_fc_p, b_fc_p = pack_params(params)
    VP = w_fc_p.shape[1]
    HC = _round_up(2 * H, LANE)
    tok = tokens.reshape(B, 1).astype(jnp.int32)

    full = lambda shape: pl.BlockSpec(shape, lambda: tuple(0 for _ in shape))

    pred_p, hc = pl.pallas_call(
        decoder_kernel,
        grid=(),
        in_specs=[
            full((B, 1)), full((B, H)), full((B, H)), full((V, E)),
            full((E + H, 4 * H)), full((1, 4 * H)),
            full((H, VP)), full((1, VP)),
        ],
        out_specs=[full((B, VP)), full((B, HC))],
        out_shape=[
            jax.ShapeDtypeStruct((B, VP), jnp.float32),
            jax.ShapeDtypeStruct((B, HC), jnp.float32),
        ],
    )(tok, h0, c0, emb, w_g, b_g, w_fc_p, b_fc_p)

    pred = pred_p[:, :V]
    h_new = hc[:, :H]
    c_new = hc[:, H:2 * H]
    return pred, h_new[None], c_new[None]


def decoder_reference(tokens, hidden, cell, params):
    """Pure-JAX reference matching PyTorch LSTMCell semantics (unfused params)."""
    x = jnp.take(params["emb"], tokens, axis=0)
    h, c = hidden[0], cell[0]
    gs = [x @ params["w_ih"][k] + h @ params["w_hh"][k] + params["b"][k]
          for k in range(4)]
    i_g, f_g = jax.nn.sigmoid(gs[0]), jax.nn.sigmoid(gs[1])
    g_g, o_g = jnp.tanh(gs[2]), jax.nn.sigmoid(gs[3])
    c_new = f_g * c + i_g * g_g
    h_new = o_g * jnp.tanh(c_new)
    pred = h_new @ params["w_fc"] + params["b_fc"]
    return pred, h_new[None], c_new[None]


def init_params(key, output_dim, emb_dim, hid_dim):
    ks = jax.random.split(key, 6)
    s = 0.1
    emb = s * jax.random.normal(ks[0], (output_dim, emb_dim), jnp.float32)
    emb = emb.at[PAD_ID].set(0.0)  # padding_idx=PAD_ID
    return {
        "emb": emb,
        "w_ih": s * jax.random.normal(ks[1], (4, emb_dim, hid_dim), jnp.float32),
        "w_hh": s * jax.random.normal(ks[2], (4, hid_dim, hid_dim), jnp.float32),
        "b":    s * jax.random.normal(ks[3], (4, 1, hid_dim), jnp.float32),
        "w_fc": s * jax.random.normal(ks[4], (hid_dim, output_dim), jnp.float32),
        "b_fc": s * jax.random.normal(ks[5], (1, output_dim), jnp.float32),
    }


if __name__ == "__main__":
    output_dim, emb_dim, hid_dim, n_layers = 32, 16, 32, 1
    batch = 8

    root = jax.random.PRNGKey(0)
    k_tok, k_h, k_c, k_par = jax.random.split(root, 4)

    tokens = jax.random.randint(k_tok, (batch,), 0, output_dim, jnp.int32)
    hidden = jax.random.normal(k_h, (n_layers, batch, hid_dim), jnp.float32)
    cell = jax.random.normal(k_c, (n_layers, batch, hid_dim), jnp.float32)
    params = init_params(k_par, output_dim, emb_dim, hid_dim)

    pred, h_new, c_new = jax.block_until_ready(
        decoder_step(tokens, hidden, cell, params))

    # sanity check against pure-JAX reference
    pred_r, h_r, c_r = decoder_reference(tokens, hidden, cell, params)
    np.testing.assert_allclose(np.asarray(pred), np.asarray(pred_r),
                               rtol=1e-3, atol=1e-3)
    np.testing.assert_allclose(np.asarray(h_new), np.asarray(h_r),
                               rtol=1e-3, atol=1e-3)
    np.testing.assert_allclose(np.asarray(c_new), np.asarray(c_r),
                               rtol=1e-3, atol=1e-3)

    assert pred.shape == (batch, output_dim)
    assert h_new.shape == (n_layers, batch, hid_dim)
    assert c_new.shape == (n_layers, batch, hid_dim)
    print("KERNEL_OK")
</pallas_src>

<mosaic_0001>
module attributes {stable_mosaic.version = 11 : i64} {
  func.func @decoder_kernel(%arg0: memref<8x1xi32, #tpu.memory_space<vmem>>, %arg1: memref<8x32xf32, #tpu.memory_space<vmem>>, %arg2: memref<8x32xf32, #tpu.memory_space<vmem>>, %arg3: memref<32x16xf32, #tpu.memory_space<vmem>>, %arg4: memref<48x128xf32, #tpu.memory_space<vmem>>, %arg5: memref<1x128xf32, #tpu.memory_space<vmem>>, %arg6: memref<32x128xf32, #tpu.memory_space<vmem>>, %arg7: memref<1x128xf32, #tpu.memory_space<vmem>>, %arg8: memref<8x128xf32, #tpu.memory_space<vmem>>, %arg9: memref<8x128xf32, #tpu.memory_space<vmem>>) attributes {dimension_semantics = [], scalar_prefetch = 0 : i64, scratch_operands = 0 : i64, tpu.core_type = #tpu.core_type<tc>} {
    %c0 = arith.constant 0 : index
    %c0_0 = arith.constant 0 : index
    %0 = vector.load %arg0[%c0, %c0_0] : memref<8x1xi32, #tpu.memory_space<vmem>>, vector<8x1xi32>
    %1 = tpu.iota {dimensions = array<i32: 1>} : vector<8x32xi32>
    %2 = vector.broadcast %0 : vector<8x1xi32> to vector<8x32xi32>
    %3 = arith.cmpi eq, %1, %2 : vector<8x32xi32>
    %4 = arith.extui %3 : vector<8x32xi1> to vector<8x32xi32>
    %5 = arith.sitofp %4 : vector<8x32xi32> to vector<8x32xf32>
    %c0_1 = arith.constant 0 : index
    %c0_2 = arith.constant 0 : index
    %6 = vector.load %arg3[%c0_1, %c0_2] : memref<32x16xf32, #tpu.memory_space<vmem>>, vector<32x16xf32>
    %cst = arith.constant dense<0.000000e+00> : vector<8x16xf32>
    %7 = tpu.matmul %5, %6, %cst {dimension_numbers = #tpu.dot_dimension_numbers<[1], [0], [0], [1], [0, 0, 1, 1], [], []>} : vector<8x32xf32>, vector<32x16xf32>, vector<8x16xf32> -> vector<8x16xf32>
    %c0_3 = arith.constant 0 : index
    %c0_4 = arith.constant 0 : index
    %8 = vector.load %arg1[%c0_3, %c0_4] : memref<8x32xf32, #tpu.memory_space<vmem>>, vector<8x32xf32>
    %c0_5 = arith.constant 0 : index
    %c0_6 = arith.constant 0 : index
    %9 = vector.load %arg2[%c0_5, %c0_6] : memref<8x32xf32, #tpu.memory_space<vmem>>, vector<8x32xf32>
    %10 = tpu.concatenate %7, %8 in 1 : vector<8x16xf32>, vector<8x32xf32> -> vector<8x48xf32>
    %c0_7 = arith.constant 0 : index
    %c0_8 = arith.constant 0 : index
    %11 = vector.load %arg4[%c0_7, %c0_8] : memref<48x128xf32, #tpu.memory_space<vmem>>, vector<48x128xf32>
    %cst_9 = arith.constant dense<0.000000e+00> : vector<8x128xf32>
    %12 = tpu.matmul %10, %11, %cst_9 {dimension_numbers = #tpu.dot_dimension_numbers<[1], [0], [0], [1], [0, 0, 1, 1], [], []>} : vector<8x48xf32>, vector<48x128xf32>, vector<8x128xf32> -> vector<8x128xf32>
    %c0_10 = arith.constant 0 : index
    %c0_11 = arith.constant 0 : index
    %13 = vector.load %arg5[%c0_10, %c0_11] : memref<1x128xf32, #tpu.memory_space<vmem>>, vector<1x128xf32>
    %14 = vector.broadcast %13 : vector<1x128xf32> to vector<8x128xf32>
    %15 = arith.addf %12, %14 : vector<8x128xf32>
    %16 = vector.extract_strided_slice %15 {offsets = [0, 0], sizes = [8, 32], strides = [1, 1]} : vector<8x128xf32> to vector<8x32xf32>
    %17 = arith.negf %16 : vector<8x32xf32>
    %18 = math.exp %17 : vector<8x32xf32>
    %cst_12 = arith.constant 1.000000e+00 : f32
    %19 = vector.broadcast %cst_12 : f32 to vector<8x32xf32>
    %20 = arith.addf %19, %18 : vector<8x32xf32>
    %21 = arith.divf %19, %20 : vector<8x32xf32>
    %22 = vector.extract_strided_slice %15 {offsets = [0, 32], sizes = [8, 32], strides = [1, 1]} : vector<8x128xf32> to vector<8x32xf32>
    %23 = arith.negf %22 : vector<8x32xf32>
    %24 = math.exp %23 : vector<8x32xf32>
    %cst_13 = arith.constant 1.000000e+00 : f32
    %25 = vector.broadcast %cst_13 : f32 to vector<8x32xf32>
    %26 = arith.addf %25, %24 : vector<8x32xf32>
    %27 = arith.divf %25, %26 : vector<8x32xf32>
    %28 = vector.extract_strided_slice %15 {offsets = [0, 64], sizes = [8, 32], strides = [1, 1]} : vector<8x128xf32> to vector<8x32xf32>
    %29 = math.tanh %28 : vector<8x32xf32>
    %30 = vector.extract_strided_slice %15 {offsets = [0, 96], sizes = [8, 32], strides = [1, 1]} : vector<8x128xf32> to vector<8x32xf32>
    %31 = arith.negf %30 : vector<8x32xf32>
    %32 = math.exp %31 : vector<8x32xf32>
    %cst_14 = arith.constant 1.000000e+00 : f32
    %33 = vector.broadcast %cst_14 : f32 to vector<8x32xf32>
    %34 = arith.addf %33, %32 : vector<8x32xf32>
    %35 = arith.divf %33, %34 : vector<8x32xf32>
    %36 = arith.mulf %27, %9 : vector<8x32xf32>
    %37 = arith.mulf %21, %29 : vector<8x32xf32>
    %38 = arith.addf %36, %37 : vector<8x32xf32>
    %39 = math.tanh %38 : vector<8x32xf32>
    %40 = arith.mulf %35, %39 : vector<8x32xf32>
    %c0_15 = arith.constant 0 : index
    %c0_16 = arith.constant 0 : index
    %41 = vector.load %arg6[%c0_15, %c0_16] : memref<32x128xf32, #tpu.memory_space<vmem>>, vector<32x128xf32>
    %cst_17 = arith.constant dense<0.000000e+00> : vector<8x128xf32>
    %42 = tpu.matmul %40, %41, %cst_17 {dimension_numbers = #tpu.dot_dimension_numbers<[1], [0], [0], [1], [0, 0, 1, 1], [], []>} : vector<8x32xf32>, vector<32x128xf32>, vector<8x128xf32> -> vector<8x128xf32>
    %c0_18 = arith.constant 0 : index
    %c0_19 = arith.constant 0 : index
    %43 = vector.load %arg7[%c0_18, %c0_19] : memref<1x128xf32, #tpu.memory_space<vmem>>, vector<1x128xf32>
    %44 = vector.broadcast %43 : vector<1x128xf32> to vector<8x128xf32>
    %45 = arith.addf %42, %44 : vector<8x128xf32>
    %c0_20 = arith.constant 0 : index
    %c0_21 = arith.constant 0 : index
    %46 = vector.load %arg8[%c0_20, %c0_21] : memref<8x128xf32, #tpu.memory_space<vmem>>, vector<8x128xf32>
    tpu.vector_store %arg8[%c0_20, %c0_21], %45 {strides = array<i32>} : memref<8x128xf32, #tpu.memory_space<vmem>>, vector<8x128xf32>,
    %cst_22 = arith.constant 0.000000e+00 : f32
    %47 = vector.broadcast %cst_22 : f32 to vector<8x64xf32>
    %48 = tpu.concatenate %40, %38, %47 in 1 : vector<8x32xf32>, vector<8x32xf32>, vector<8x64xf32> -> vector<8x128xf32>
    %c0_23 = arith.constant 0 : index
    %c0_24 = arith.constant 0 : index
    %49 = vector.load %arg9[%c0_23, %c0_24] : memref<8x128xf32, #tpu.memory_space<vmem>>, vector<8x128xf32>
    tpu.vector_store %arg9[%c0_23, %c0_24], %48 {strides = array<i32>} : memref<8x128xf32, #tpu.memory_space<vmem>>, vector<8x128xf32>,
    return
  }
}

</mosaic_0001>

<bundles_post_ra>
// kernel: tpu_custom_call.1
= control target key start
LH: loop header
LB: loop body
LE: loop exit
PB: predicated region body
PF: predicated region fallthrough
CT: control target
= control target key end

     0   :  { %15 = vsyncpa [#allocation3], 0  ;;  %s510_s0 = inlined_call_operand.vmem [shape: s32[8,1], index: 0, kind: input, shape index: {}]   ;;  %s511_s1 = inlined_call_operand.vmem [shape: f32[8,32], index: 1, kind: input, shape index: {}]   ;;  %s512_s2 = inlined_call_operand.hbm [shape: f32[8,32], index: 2, kind: input, shape index: {}]   ;;  %s513_s3 = inlined_call_operand.vmem [shape: f32[32,16], index: 3, kind: input, shape index: {}]   ;;  %s514_s4 = inlined_call_operand.vmem [shape: f32[48,128], index: 4, kind: input, shape index: {}]   ;;  %s515_s5 = inlined_call_operand.vmem [shape: f32[1,128], index: 5, kind: input, shape index: {}]   ;;  %s516_s6 = inlined_call_operand.hbm [shape: f32[32,128], index: 6, kind: input, shape index: {}]   ;;  %s517_s7 = inlined_call_operand.vmem [shape: f32[1,128], index: 7, kind: input, shape index: {}]   ;;  %s518_s8 = inlined_call_operand.hbm [shape: f32[8,128], index: 8, kind: output, shape index: {0}]   ;;  %s519_s9 = inlined_call_operand.hbm [shape: f32[8,128], index: 9, kind: output, shape index: {1}]  }
   0x1   :  { %16 = vsyncpa [#allocation6], 0 }
   0x2   :  { %17 = vsyncpa [#allocation4], 0 }
   0x3   :  { %18 = vsyncpa [#allocation9], 0  ;;  %s28_s11 = sshll.u32 %s512_s2, 4  ;;  %s387_s12 = smov [#allocation2]   ;;  %s29_s11 = int_to_ptr.hbm [resolvable:$true] %s28_s11 }
   0x4   :  { %s30_s13 = sshll.u32 %s387_s12, 4  ;;  %s44_s16 = sshll.u32 %s516_s6, 4  ;;  %s31_s13 = int_to_ptr.vmem [resolvable:$true] %s30_s13  ;;  %s45_s16 = int_to_ptr.hbm [resolvable:$true] %s44_s16 }
   0x5   :  { %33 = dma.hbm_to_vmem [thread:$0]  %s29_s11, 128, %s31_s13, [#allocation3]  }
   0x6   :  { %s388_s17 = smov [#allocation5]   ;;  %s389_s19 = smov 128  }
   0x7   :  { %s46_s18 = sshll.u32 %s388_s17, 4  ;;  %s390_s20 = smov 8   ;;  %s47_s18 = int_to_ptr.vmem [resolvable:$true] %s46_s18 }
   0x8   :  { %52 = dma.hbm_to_vmem [thread:$0]  %s45_s16, 512, %s47_s18, [#allocation6], %s389_s19, %s389_s19, %s390_s20  }
   0x9   :  { %379 = dma.done.wait [#allocation3], 128  }
   0xa   :  { %380 = vsyncadd [#allocation3], 4294967168 }
   0xb   :  { %381 = dma.done.wait [#allocation6], 512  }
   0xc   :  { %382 = vsyncadd [#allocation6], 4294966784  ;;  %v391_v0 = vmov 0   ;;  %v63_v1 = vld [vmem:[%s510_s0] sm:$0xff]  ;;  %v75_v2 = vld [vmem:[%s513_s3 + $0x18] sm:$0xff]  ;;  %s392_s13 = smov 16   ;;  %v64_v12 = vlaneseq }
   0xd   :  { %272 = vset.pattern.permute.xlu0 %v391_v0  ;;  %v74_v3 = vld [vmem:[%s513_s3 + $0x10] sm:$0xff]  ;;  %92 = vmatpush.msra.mxu0 %v75_v2  ;;  %v73_v4 = vld [vmem:[%s513_s3 + $0x8] sm:$0xff]  ;;  %v72_v5 = vld [vmem:[%s513_s3] sm:$0xff]  ;;  %vm76_vm0 = vcmask 261120   ;;  %v393_v15 = vmov 0.0   ;;  %vm106_vm2 = vcmask 130048  }
   0xe   :  { %67 = vperm.xlu0 %272, %v63_v1   ;;  %v100_v6 = vld [vmem:[%s511_s1] sm:$0xff]  ;;  %v113_v7 = vld [vmem:[%s514_s4 + $0x28] sm:$0xff]  ;;  %v111_v9 = vld [vmem:[%s514_s4 + $0x18] sm:$0xff]  ;;  %v65_v13 = vand.u32 127, %v64_v12  ;;  %vm118_vm3 = vcmask 392192   ;;  %s394_s21 = smov 64  }
   0xf   :  { %93 = vmatpush.msra.mxu0 %v74_v3  ;;  %v112_v8 = vld [vmem:[%s514_s4 + $0x20] sm:$0xff]  ;;  %132 = vmatpush.msra.mxu1 %v113_v7  ;;  %v110_v10 = vld [vmem:[%s514_s4 + $0x10] sm:$0xff]  ;;  %v109_v11 = vld [vmem:[%s514_s4 + $0x8] sm:$0xff]  ;;  %vm219_vm8 = vcmask 523264   ;;  %s240_s24 = sshll.u32 %s519_s9, 4  ;;  %s397_s27 = smov [#allocation7]   ;;  %s241_s24 = int_to_ptr.hbm [resolvable:$true] %s240_s24 }
  0x10   :  { %v108_v17 = vld [vmem:[%s514_s4] sm:$0xff]  ;;  %s395_s4 = smov 32   ;;  %v185_v47 = vld [vmem:[#allocation5 + $0x10] sm:$0xff]  ;;  %v184_v48 = vld [vmem:[#allocation5 + $0x8] sm:$0xff]  ;;  %s227_s28 = sshll.u32 %s397_s27, 4  ;;  %s228_s28 = int_to_ptr.vmem [resolvable:$true] %s227_s28 }
  0x11   :  { %94 = vmatpush.msra.mxu0 %v73_v4  ;;  %133 = vmatpush.msra.mxu1 %v112_v8  ;;  %v273_v21 = vld [vmem:[%s515_s5] ss:$0 sm:$0xff]  ;;  %v183_v49 = vld [vmem:[#allocation5] sm:$0xff]  ;;  %s396_s5 = smov [#allocation8]   ;;  %s229_s30 = sshll.u32 %s518_s8, 4  ;;  %s230_s30 = int_to_ptr.hbm [resolvable:$true] %s229_s30 }
  0x12   :  { %v101_v25 = vld [vmem:[#allocation2] sm:$0xff]  ;;  %s238_s22 = sshll.u32 %s396_s5, 4  ;;  %s239_s22 = int_to_ptr.vmem [resolvable:$true] %s238_s22 }
  0x13   :  { %95 = vmatpush.msra.mxu0 %v72_v5  ;;  %134 = vmatpush.msra.mxu1 %v111_v9  ;;  %v186_v46 = vld [vmem:[#allocation5 + $0x18] sm:$0xff] }
  0x14   :  { %208 = vmatpush.msra.mxu2 %v186_v46  ;;  %v274_v55 = vld [vmem:[%s517_s7] ss:$0 sm:$0xff] }
  0x15   :  { %135 = vmatpush.msra.mxu1 %v110_v10 }
  0x16   :  { %103 = vrot.lane.b32.xlu0 %v100_v6, %s392_s13  ;;  %209 = vmatpush.msra.mxu2 %v185_v47 }
  0x17   :  { %136 = vmatpush.msra.mxu1 %v109_v11 }
  0x18   :  { %210 = vmatpush.msra.mxu2 %v184_v48 }
  0x19   :  { %137 = vmatpush.msra.mxu1 %v108_v17 }
  0x1a   :  { %211 = vmatpush.msra.mxu2 %v183_v49 }
  0x80   :  { %v68_v14 = vpop.permute.xlu0 %67 }
  0x81   :  { %vm69_vm1 = vcmp.eq.s32.totalorder %v65_v13, %v68_v14 }
  0x82   :  { %v256_v16 = vsel %vm69_vm1, 1.0, %v393_v15 }
  0x83   :  { %257 = vmatmul.msk.f32.vlgmr.msra.gmra.mxu0 %vm76_vm0, %v256_v16 }
  0x88   :  { %v104_v18 = vpop.permute.xlu0 %103 }
 0x100   :  { %v97_v19 = vpop.f32.mrf.mxu0 }
 0x101   :  { %v107_v20 = vsel %vm106_vm2, %v97_v19, %v104_v18 }
 0x102   :  { %258 = vmatmul.msk.f32.vlgmr.msra.gmra.mxu1 %vm118_vm3, %v107_v20 }
 0x17f   :  { %v139_v22 = vpop.f32.mrf.mxu1 }
 0x180   :  { %v140_v23 = vadd.f32 %v273_v21, %v139_v22 }
 0x182   :  { %275 = vtanh.f32 %v140_v23  ;;  %v259_v26 = vmul.f32 -1.442695, %v140_v23 }
 0x184   :  { %277 = vpow2.f32 %v259_v26 }
 0x188   :  { %v276_v24 = vpop.eup %275 }
 0x189   :  { %168 = vrot.lane.b32.xlu1 %v276_v24, %s394_s21 }
 0x18a   :  { %v278_v27 = vpop.eup %277 }
 0x18b   :  { %v145_v28 = vadd.f32 1.0, %v278_v27 }
 0x18d   :  { %279 = vrcp.f32 %v145_v28  ;;  %v157_v34 = vand.u32 2147483648, %v145_v28  ;;  %vm151_vm5 = vweird.f32 %v145_v28  ;;  %v155_v35 = vand.u32 2147483647, %v145_v28 }
 0x18f   :  { %v158_v37 = vor.u32 1.1754944e-38, %v157_v34  ;;  %vm156_vm7 = vcmp.eq.f32.partialorder %v155_v35, 8.507059e+37 }
 0x191   :  { %163 = vrot.lane.b32.xlu1 %v101_v25, %s395_s4 }
 0x193   :  { %v280_v29 = vpop.eup %279 }
 0x194   :  { %v147_v30 = vmul.f32 %v280_v29, %v145_v28  ;;  %vm152_vm4 = vweird.f32 %v280_v29 }
 0x195   :  { %vm153_vm6 = vmor %vm151_vm5, %vm152_vm4 }
 0x196   :  { %v148_v31 = vsub.f32 1.0, %v147_v30 }
 0x198   :  { %v149_v32 = vmul.f32 %v280_v29, %v148_v31 }
 0x19a   :  { %v150_v33 = vadd.f32 %v280_v29, %v149_v32 }
 0x19c   :  { %v154_v36 = vsel %vm153_vm6, %v280_v29, %v150_v33 }
 0x19d   :  { %v159_v39 = vsel %vm156_vm7, %v158_v37, %v154_v36 }
 0x1fb   :  { %v169_v38 = vpop.permute.xlu1 %168 }
 0x1fc   :  { %v171_v40 = vmul.f32 %v169_v38, %v159_v39 }
 0x1fe   :  { %173 = vrot.lane.b32.xlu2 %v171_v40, %s395_s4 }
 0x203   :  { %v164_v41 = vpop.permute.xlu1 %163 }
 0x204   :  { %v166_v42 = vmul.f32 %v164_v41, %v159_v39 }
 0x258   :  { %v174_v43 = vpop.permute.xlu2 %173 }
 0x259   :  { %v176_v44 = vadd.f32 %v174_v43, %v166_v42 }
 0x25b   :  { %281 = vtanh.f32 %v176_v44 }
 0x261   :  { %v282_v45 = vpop.eup %281 }
 0x262   :  { %179 = vrot.lane.b32.xlu2 %v282_v45, %s394_s21 }
 0x2bc   :  { %v180_v50 = vpop.permute.xlu2 %179 }
 0x2bd   :  { %v182_v51 = vmul.f32 %v180_v50, %v159_v39 }
 0x2bf   :  { %192 = vrot.lane.b32.xlu0 %v182_v51, %s395_s4 }
 0x331   :  { %v193_v52 = vpop.permute.xlu0 %192 }
 0x332   :  { %v218_v53 = vsel %vm76_vm0, %v193_v52, %v176_v44  ;;  %260 = vmatmul.msk.f32.vlgmr.msra.gmra.mxu2 %vm76_vm0, %v193_v52 }
 0x333   :  { %v220_v54 = vsel %vm219_vm8, %v218_v53, 0.0 }
 0x334   :  { %221 = vst [vmem:[#allocation8] sm:$0xff] %v220_v54 }
 0x335   :  { %243 = dma.vmem_to_hbm [thread:$0]  %s239_s22, 128, %s241_s24, [#allocation9]  }
 0x3b5   :  { %v213_v56 = vpop.f32.mrf.mxu2 }
 0x3b6   :  { %v214_v57 = vadd.f32 %v274_v55, %v213_v56 }
 0x3b8   :  { %216 = vst [vmem:[#allocation7] sm:$0xff] %v214_v57 }
 0x3b9   :  { %232 = dma.vmem_to_hbm [thread:$0]  %s228_s28, 128, %s230_s30, [#allocation4]  }
 0x3ba   :  { %383 = dma.done.wait [#allocation4], 128  }
 0x3bb   :  { %384 = vsyncadd [#allocation4], 4294967168 }
 0x3bc   :  { %385 = dma.done.wait [#allocation9], 128  }
 0x3bd   :  { %386 = vsyncadd [#allocation9], 4294967168 }
 0x3be   :  { %252 = vsyncpa [#allocation3], 1 }
 0x3bf   :  { %253 = vsyncpa [#allocation6], 1 }
 0x3c0   :  { %254 = vsyncpa [#allocation4], 1 }
 0x3c1   :  { %255 = vsyncpa [#allocation9], 1 }

</bundles_post_ra>
